<compile_context>
chip_gen: v6e
topology: v6e:2x2x1
jax: 0.10.0
libtpu: 0.0.40
codegen_flags: <defaults>
</compile_context>

<pallas_src>
import math
import functools

import jax
import jax.numpy as jnp
import numpy as np
from jax.experimental import pallas as pl
from jax.experimental.pallas import tpu as pltpu


def _sphereface_kernel(x_ref, w_ref, inv_wn_ref, inv_xn_ref, label_ref, phi_ref,
                       out_ref, *, s):
    j = pl.program_id(0)                      # class-tile index (outer grid axis)

    # MXU: contract the feature (lane) dim of both operands -> (TB, TC), f32 acc.
    # (Weight consumed as (C, D) directly — no (D, C) transpose in HBM.)
    ip = jax.lax.dot_general(x_ref[...], w_ref[...], (((1,), (1,)), ((), ())),
                             preferred_element_type=jnp.float32)

    # Cosine similarity via broadcast reciprocal multiplies (no dense divide).
    c = jnp.clip(ip * inv_xn_ref[...] * inv_wn_ref[...], -1.0 + 1e-05, 1.0 - 1e-05)

    # Target mask: (1, TC) lane iota vs. the tile-relative label (TB, 1).
    TB, TC = c.shape
    lane = jax.lax.broadcasted_iota(jnp.int32, (1, TC), 1)
    is_target = lane == (label_ref[...] - j * TC)            # (TB, TC)

    # Non-target columns collapse to s*clip(cos_theta); target column takes the
    # per-row phi precomputed (exactly, in f32) in the wrapper.
    out_ref[...] = (jnp.float32(s)
                    * jnp.where(is_target, phi_ref[...], c)).astype(out_ref.dtype)


def _round_up(n, m):
    return ((n + m - 1) // m) * m


def _choose_tile(n, preferred, align):
    """Return (tile, n_padded).

    Small dims use the full extent (valid as a full-dimension block).  Large
    dims prefer an aligned exact divisor <= `preferred`; otherwise fall back
    to `preferred` with zero-padding (never to the full dimension, which could
    blow VMEM for large, non-aligned class counts).
    """
    if n <= preferred:
        return n, n
    t = (preferred // align) * align
    while t >= align:
        if n % t == 0:
            return t, n
        t -= align
    t = (preferred // align) * align
    return t, _round_up(n, t)


def _vmem_capacity_bytes():
    try:
        cap = getattr(pltpu.get_tpu_info(), "vmem_capacity_bytes", None)
        if cap:
            return int(cap)
    except Exception:
        pass
    return 64 * 1024 * 1024        # conservative (v7x-sized) fallback


def sphereface_loss(inputs, weight, label, *, s=30.0, m=1.5,
                    tile_b=None, tile_c=None,
                    compute_dtype=jnp.bfloat16, out_dtype=jnp.float32):
    """inputs: (B, D) float, weight: (C, D) float (PyTorch layout),
    label: (B,) int.  Returns logits (B, C) in `out_dtype`."""
    B, D = inputs.shape
    C, Dw = weight.shape
    assert D == Dw

    x32 = inputs.astype(jnp.float32)
    w32 = weight.astype(jnp.float32)
    lbl = label.astype(jnp.int32)

    # ---- hoisted, exact target-class math (f32; one arccos per row) ----
    xn = jnp.sqrt(jnp.sum(x32 * x32, axis=1))                         # (B,)
    wn = jnp.sqrt(jnp.sum(w32 * w32, axis=1))                         # (C,)
    ip_tgt = jnp.sum(x32 * jnp.take(w32, lbl, axis=0), axis=1)        # (B,)
    cos_tgt = ip_tgt / jnp.maximum(xn * jnp.take(wn, lbl), 1e-8)      # exact ref clamp
    m_theta = jnp.float32(m) * jnp.arccos(
        jnp.clip(cos_tgt, -1.0 + 1e-05, 1.0 - 1e-05))
    k = jnp.floor(m_theta / jnp.float32(math.pi))
    sign = -2.0 * jnp.remainder(k, 2.0) + 1.0
    phi_tgt = (sign * jnp.cos(m_theta) - 2.0 * k).reshape(B, 1)       # (B, 1) f32

    # ---- generation-aware tiling / VMEM budget ----
    itemsize = jnp.dtype(compute_dtype).itemsize
    if _vmem_capacity_bytes() >= 96 * 1024 * 1024:     # v5e / v6e: 128 MiB VMEM
        w_budget, tc_cap, vmem_limit = 16 << 20, 4096, 64 << 20
    else:                                              # v7x: 64 MiB per TensorCore
        w_budget, tc_cap, vmem_limit = 8 << 20, 2048, 40 << 20
    tc_pref = max(128, min(tc_cap,
                           (w_budget // (2 * itemsize * max(D, 1))) // 128 * 128))
    align_b = 16 if jnp.dtype(compute_dtype) == jnp.dtype(jnp.bfloat16) else 8

    if tile_b is None:
        tb, B_pad = _choose_tile(B, 256, align_b)
    else:
        tb, B_pad = tile_b, _round_up(B, tile_b)
    if tile_c is None:
        tc, C_pad = _choose_tile(C, tc_pref, 128)
    else:
        tc, C_pad = tile_c, _round_up(C, tile_c)
    assert B_pad % tb == 0 and C_pad % tc == 0

    # ---- zero-pad to tile multiples (output sliced back after the call) ----
    if B_pad != B:
        x32 = jnp.pad(x32, ((0, B_pad - B), (0, 0)))
        lbl = jnp.pad(lbl, (0, B_pad - B))
        phi_tgt = jnp.pad(phi_tgt, ((0, B_pad - B), (0, 0)))
        xn = jnp.pad(xn, (0, B_pad - B))
    if C_pad != C:
        w32 = jnp.pad(w32, ((0, C_pad - C), (0, 0)))
        wn = jnp.pad(wn, (0, C_pad - C))

    # Hoisted reciprocal norms (per-factor clamp keeps the product >= 1e-8,
    # matching the reference clamp(min=1e-8) for all non-degenerate inputs).
    inv_xn = (1.0 / jnp.maximum(xn, 1e-4)).reshape(B_pad, 1)
    inv_wn = (1.0 / jnp.maximum(wn, 1e-4)).reshape(1, C_pad)
    lbl2d = lbl.reshape(B_pad, 1)

    x_in = x32.astype(compute_dtype)   # MXU operands only; everything else f32
    w_in = w32.astype(compute_dtype)

    kernel = functools.partial(_sphereface_kernel, s=float(s))
    n_ct, n_bt = C_pad // tc, B_pad // tb
    grid = (n_ct, n_bt)    # class OUTER: weight tile resident across batch tiles
    # v7x megacore split on classes (disjoint weight working sets) when possible.
    dims = ("parallel", "arbitrary") if n_ct >= 2 else ("parallel", "parallel")

    out = pl.pallas_call(
        kernel,
        out_shape=jax.ShapeDtypeStruct((B_pad, C_pad), out_dtype),
        grid=grid,
        in_specs=[
            pl.BlockSpec((tb, D), lambda j, i: (i, 0)),   # activations (batch-tiled)
            pl.BlockSpec((tc, D), lambda j, i: (j, 0)),   # weight (class-tiled)
            pl.BlockSpec((1, tc), lambda j, i: (0, j)),   # 1/||w||
            pl.BlockSpec((tb, 1), lambda j, i: (i, 0)),   # 1/||x||
            pl.BlockSpec((tb, 1), lambda j, i: (i, 0)),   # labels
            pl.BlockSpec((tb, 1), lambda j, i: (i, 0)),   # per-row target phi
        ],
        out_specs=pl.BlockSpec((tb, tc), lambda j, i: (i, j)),
        compiler_params=pltpu.CompilerParams(
            dimension_semantics=dims,
            vmem_limit_bytes=vmem_limit,
        ),
    )(x_in, w_in, inv_wn, inv_xn, lbl2d, phi_tgt)

    if (B_pad, C_pad) != (B, C):
        out = out[:B, :C]
    return out


def _reference(x, w, label, s, m):
    """Pure-JAX reference mirroring the PyTorch forward."""
    ip = x @ w.T
    w1 = jnp.sqrt(jnp.sum(x * x, axis=1))
    w2 = jnp.sqrt(jnp.sum(w * w, axis=1))
    cos_theta = ip / jnp.maximum(jnp.outer(w1, w2), 1e-8)
    m_theta = jnp.arccos(jnp.clip(cos_theta, -1.0 + 1e-05, 1.0 - 1e-05))
    mult = jnp.where(jnp.arange(w.shape[0])[None, :] == label[:, None], m, 1.0)
    m_theta = m_theta * mult
    k = jnp.floor(m_theta / math.pi)
    sign = -2.0 * jnp.remainder(k, 2.0) + 1.0
    phi = sign * jnp.cos(m_theta) - 2.0 * k
    return s * (cos_theta + (phi - cos_theta))


def _make_inputs(key, in_features, out_features, batch):
    kw, kx, kl = jax.random.split(key, 3)
    bound = math.sqrt(6.0 / (in_features + out_features))   # xavier_uniform_
    weight = jax.random.uniform(kw, (out_features, in_features), jnp.float32,
                                minval=-bound, maxval=bound)
    x = jax.random.normal(kx, (batch, in_features), dtype=jnp.float32)
    label = jax.random.randint(kl, (batch,), 0, out_features, dtype=jnp.int32)
    return x, weight, label


if __name__ == "__main__":
    s_param, m_param = 30.0, 1.5

    # Case 1: tiny shapes, single tile, f32 compute path.
    x, weight, label = _make_inputs(jax.random.PRNGKey(0), 32, 16, 8)
    logits = jax.block_until_ready(
        sphereface_loss(x, weight, label, s=s_param, m=m_param,
                        compute_dtype=jnp.float32))
    assert logits.shape == (8, 16)
    np.testing.assert_allclose(
        np.asarray(logits),
        np.asarray(_reference(x, weight, label, s_param, m_param)),
        rtol=1e-2, atol=1e-2)

    # Case 2: default bf16 matmul, 2-D (class-outer, batch-inner) tiled path.
    x2, weight2, label2 = _make_inputs(jax.random.PRNGKey(1), 32, 256, 16)
    logits2 = jax.block_until_ready(
        sphereface_loss(x2, weight2, label2, s=s_param, m=m_param,
                        tile_b=8, tile_c=128))
    assert logits2.shape == (16, 256)
    np.testing.assert_allclose(
        np.asarray(logits2),
        np.asarray(_reference(x2, weight2, label2, s_param, m_param)),
        rtol=5e-2, atol=0.3)

    # Case 3: non-aligned B and C exercise the zero-pad + slice path (f32).
    x3, weight3, label3 = _make_inputs(jax.random.PRNGKey(2), 32, 200, 12)
    logits3 = jax.block_until_ready(
        sphereface_loss(x3, weight3, label3, s=s_param, m=m_param,
                        tile_b=8, tile_c=128, compute_dtype=jnp.float32))
    assert logits3.shape == (12, 200)
    np.testing.assert_allclose(
        np.asarray(logits3),
        np.asarray(_reference(x3, weight3, label3, s_param, m_param)),
        rtol=1e-2, atol=1e-2)

    print("KERNEL_OK")
</pallas_src>

<mosaic_0001>
module attributes {stable_mosaic.version = 11 : i64} {
  func.func @_sphereface_kernel(%arg0: i32, %arg1: i32, %arg2: memref<8x32xf32, #tpu.memory_space<vmem>>, %arg3: memref<16x32xf32, #tpu.memory_space<vmem>>, %arg4: memref<1x16xf32, #tpu.memory_space<vmem>>, %arg5: memref<8x1xf32, #tpu.memory_space<vmem>>, %arg6: memref<8x1xi32, #tpu.memory_space<vmem>>, %arg7: memref<8x1xf32, #tpu.memory_space<vmem>>, %arg8: memref<8x16xf32, #tpu.memory_space<vmem>>) attributes {dimension_semantics = [#tpu.dimension_semantics<parallel>, #tpu.dimension_semantics<parallel>], iteration_bounds = array<i64: 1, 1>, scalar_prefetch = 0 : i64, scratch_operands = 0 : i64, tpu.core_type = #tpu.core_type<tc>, window_params = [{transform_indices = @transform_0, window_bounds = array<i64: 8, 32>}, {transform_indices = @transform_1, window_bounds = array<i64: 16, 32>}, {transform_indices = @transform_2, window_bounds = array<i64: 1, 16>}, {transform_indices = @transform_3, window_bounds = array<i64: 8, 1>}, {transform_indices = @transform_4, window_bounds = array<i64: 8, 1>}, {transform_indices = @transform_5, window_bounds = array<i64: 8, 1>}, {transform_indices = @transform_6, window_bounds = array<i64: 8, 16>}]} {
    %c0 = arith.constant 0 : index
    %c0_0 = arith.constant 0 : index
    %0 = vector.load %arg2[%c0, %c0_0] : memref<8x32xf32, #tpu.memory_space<vmem>>, vector<8x32xf32>
    %c0_1 = arith.constant 0 : index
    %c0_2 = arith.constant 0 : index
    %1 = vector.load %arg3[%c0_1, %c0_2] : memref<16x32xf32, #tpu.memory_space<vmem>>, vector<16x32xf32>
    %cst = arith.constant dense<0.000000e+00> : vector<8x16xf32>
    %2 = tpu.matmul %0, %1, %cst {dimension_numbers = #tpu.dot_dimension_numbers<[1], [1], [0], [0], [0, 0, 1, 0], [], []>} : vector<8x32xf32>, vector<16x32xf32>, vector<8x16xf32> -> vector<8x16xf32>
    %c0_3 = arith.constant 0 : index
    %c0_4 = arith.constant 0 : index
    %3 = vector.load %arg5[%c0_3, %c0_4] : memref<8x1xf32, #tpu.memory_space<vmem>>, vector<8x1xf32>
    %4 = vector.broadcast %3 : vector<8x1xf32> to vector<8x16xf32>
    %5 = arith.mulf %2, %4 : vector<8x16xf32>
    %c0_5 = arith.constant 0 : index
    %c0_6 = arith.constant 0 : index
    %6 = vector.load %arg4[%c0_5, %c0_6] : memref<1x16xf32, #tpu.memory_space<vmem>>, vector<1x16xf32>
    %7 = vector.broadcast %6 : vector<1x16xf32> to vector<8x16xf32>
    %8 = arith.mulf %5, %7 : vector<8x16xf32>
    %cst_7 = arith.constant -0.999989986 : f32
    %cst_8 = arith.constant 0.999989986 : f32
    %9 = vector.broadcast %cst_7 : f32 to vector<8x16xf32>
    %10 = arith.maximumf %9, %8 : vector<8x16xf32>
    %11 = vector.broadcast %cst_8 : f32 to vector<8x16xf32>
    %12 = arith.minimumf %11, %10 : vector<8x16xf32>
    %13 = tpu.iota {dimensions = array<i32: 1>} : vector<1x16xi32>
    %c0_9 = arith.constant 0 : index
    %c0_10 = arith.constant 0 : index
    %14 = vector.load %arg6[%c0_9, %c0_10] : memref<8x1xi32, #tpu.memory_space<vmem>>, vector<8x1xi32>
    %c16_i32 = arith.constant 16 : i32
    %15 = arith.muli %arg0, %c16_i32 : i32
    %16 = vector.broadcast %15 : i32 to vector<8x1xi32>
    %17 = arith.subi %14, %16 : vector<8x1xi32>
    %18 = vector.broadcast %13 : vector<1x16xi32> to vector<8x16xi32>
    %19 = vector.broadcast %17 : vector<8x1xi32> to vector<8x16xi32>
    %20 = arith.cmpi eq, %18, %19 : vector<8x16xi32>
    %c0_11 = arith.constant 0 : index
    %c0_12 = arith.constant 0 : index
    %21 = vector.load %arg7[%c0_11, %c0_12] : memref<8x1xf32, #tpu.memory_space<vmem>>, vector<8x1xf32>
    %22 = vector.shape_cast %21 : vector<8x1xf32> to vector<8x1xf32>
    %23 = vector.broadcast %22 : vector<8x1xf32> to vector<8x16xf32>
    %24 = arith.select %20, %23, %12 : vector<8x16xi1>, vector<8x16xf32>
    %cst_13 = arith.constant 3.000000e+01 : f32
    %25 = vector.broadcast %cst_13 : f32 to vector<8x16xf32>
    %26 = arith.mulf %25, %24 : vector<8x16xf32>
    %c0_14 = arith.constant 0 : index
    %c0_15 = arith.constant 0 : index
    %27 = vector.load %arg8[%c0_14, %c0_15] : memref<8x16xf32, #tpu.memory_space<vmem>>, vector<8x16xf32>
    tpu.vector_store %arg8[%c0_14, %c0_15], %26 {strides = array<i32>} : memref<8x16xf32, #tpu.memory_space<vmem>>, vector<8x16xf32>,
    return
  }
  func.func @transform_0(%arg0: i32, %arg1: i32) -> (i32, i32) {
    %c0_i32 = arith.constant 0 : i32
    %c0_i32_0 = arith.constant 0 : i32
    return %arg1, %c0_i32 : i32, i32
  }
  func.func @transform_1(%arg0: i32, %arg1: i32) -> (i32, i32) {
    %c0_i32 = arith.constant 0 : i32
    %c0_i32_0 = arith.constant 0 : i32
    return %arg0, %c0_i32 : i32, i32
  }
  func.func @transform_2(%arg0: i32, %arg1: i32) -> (i32, i32) {
    %c0_i32 = arith.constant 0 : i32
    %c0_i32_0 = arith.constant 0 : i32
    return %c0_i32, %arg0 : i32, i32
  }
  func.func @transform_3(%arg0: i32, %arg1: i32) -> (i32, i32) {
    %c0_i32 = arith.constant 0 : i32
    %c0_i32_0 = arith.constant 0 : i32
    return %arg1, %c0_i32 : i32, i32
  }
  func.func @transform_4(%arg0: i32, %arg1: i32) -> (i32, i32) {
    %c0_i32 = arith.constant 0 : i32
    %c0_i32_0 = arith.constant 0 : i32
    return %arg1, %c0_i32 : i32, i32
  }
  func.func @transform_5(%arg0: i32, %arg1: i32) -> (i32, i32) {
    %c0_i32 = arith.constant 0 : i32
    %c0_i32_0 = arith.constant 0 : i32
    return %arg1, %c0_i32 : i32, i32
  }
  func.func @transform_6(%arg0: i32, %arg1: i32) -> (i32, i32) {
    %c0_i32 = arith.constant 0 : i32
    return %arg1, %arg0 : i32, i32
  }
}

</mosaic_0001>

<bundles_post_ra>
// kernel: tpu_custom_call.1
= control target key start
LH: loop header
LB: loop body
LE: loop exit
PB: predicated region body
PF: predicated region fallthrough
CT: control target
= control target key end

     0   :  { %vm27_vm0 = vcmask 261120   ;;  %v201_v1 = vmov 0.0   ;;  %vm202_vm1 = vmmov 0   ;;  %v203_v3 = vmov 0   ;;  %s267_s0 = inlined_call_operand.vmem [shape: f32[8,32], index: 0, kind: input, shape index: {}]   ;;  %s268_s1 = inlined_call_operand.vmem [shape: f32[16,32], index: 1, kind: input, shape index: {}]   ;;  %s269_s2 = inlined_call_operand.vmem [shape: f32[1,16], index: 2, kind: input, shape index: {}]   ;;  %s270_s3 = inlined_call_operand.vmem [shape: f32[8,1], index: 3, kind: input, shape index: {}]   ;;  %s271_s4 = inlined_call_operand.vmem [shape: s32[8,1], index: 4, kind: input, shape index: {}]   ;;  %s272_s5 = inlined_call_operand.vmem [shape: f32[8,1], index: 5, kind: input, shape index: {}]   ;;  %s273_s6 = inlined_call_operand.hbm [shape: f32[8,16], index: 6, kind: output, shape index: {}]  }
   0x1   :  { %v26_v0 = vld [vmem:[%s268_s1 + $0x8] sm:$0xff]  ;;  %166 = vmatprep.subr.mxu0 %v201_v1  ;;  %170 = vmatprep.mubr.msk.f32.mxu0 %vm202_vm1, %v201_v1  ;;  %v107_v2 = vld [vmem:[%s270_s3] sm:$0xff] }
   0x2   :  { %167 = vmatpush3.xpose.msk.msra.mxu0 %vm27_vm0, %v26_v0  ;;  %177 = vset.pattern.permute.xlu0 %v203_v3  ;;  %v134_v4 = vld [vmem:[%s272_s5] sm:$0xff] }
   0x3   :  { %11 = vsyncpa [#allocation3], 0  ;;  %168 = vmatprep.subr.mxu0 %v201_v1  ;;  %v25_v5 = vld [vmem:[%s268_s1] sm:$0xff]  ;;  %110 = vperm.xlu0 %177, %v107_v2   ;;  %v124_v9 = vlaneseq  ;;  %vm142_vm3 = vcmask 130048  }
   0x4   :  { %v126_v6 = vld [vmem:[%s271_s4] sm:$0xff]  ;;  %178 = vset.pattern.permute.xlu1 %v203_v3  ;;  %s204_s4 = smov [#allocation2]  }
   0x5   :  { %137 = vperm.xlu1 %178, %v134_v4   ;;  %v24_v7 = vld [vmem:[%s267_s0] sm:$0xff]  ;;  %v125_v13 = vand.u32 127, %v124_v9  ;;  %s150_s8 = sshll.u32 %s204_s4, 4  ;;  %s151_s8 = int_to_ptr.vmem [resolvable:$true] %s150_s8 }
   0x6   :  { %169 = vmatpush3.xpose.msk.msra.mxu0 %vm27_vm0, %v25_v5  ;;  %v161_v11 = vld [vmem:[%s269_s2] ss:$0 sm:$0xff]  ;;  %s179_s0 = scalar_lea.vmem %s151_s8, 128  ;;  %p184_p1 = scmp.lt.s32.totalorder %s151_s8, %s151_s8 }
   0x7   :  { %131 = vperm.xlu0 %177, %v126_v6   ;;  %p180_p0 = scmp.ne.s32.totalorder %s151_s8, %s179_s0  ;;  %p185_p2 = scmp.lt.s32.totalorder %s179_s0, %s179_s0 }
   0x9   :  { %171 = vmatmul.mubr.msk.f32.vlgmr.msra.gmra.mxu0 %vm27_vm0, %v24_v7  ;;  %p186_p3 = por %p185_p2, %p184_p1 }
   0xb   :  { %p187_p4 = pnand %p186_p3, %p180_p0 }
  0x7e   :  { %v111_v8 = vpop.permute.xlu0 %110 }
  0x80   :  { %v138_v17 = vpop.permute.xlu1 %137 }
  0x82   :  { %v132_v15 = vpop.permute.xlu0 %131 }
  0x83   :  { %vm133_vm2 = vcmp.eq.s32.totalorder %v125_v13, %v132_v15 }
  0xc9   :  { %v103_v10 = vpop.f32.mrf.mxu0 }
  0xca   :  { %v113_v12 = vmul.f32 %v111_v8, %v103_v10 }
  0xcb   :  { %v172_v14 = vpop.f32.mrf.mxu0 }
  0xcc   :  { %v121_v16 = vmul.f32 %v161_v11, %v113_v12 }
  0xce   :  { %v162_v18 = vclamps-f32 %v121_v16, 0.99999 }
  0xd0   :  { %v140_v19 = vsel %vm133_vm2, %v138_v17, %v162_v18 }
  0xd1   :  { %v141_v20 = vmul.f32 30.0, %v140_v19 }
  0xd3   :  { %143 = vst.msk [vmem:[#allocation2] sm:$0xff] %vm142_vm3, %v141_v20 }
  0xd4   :  { %190 = shalt.err (!%p187_p4)
}
  0xd5   :  { %153 = dma.vmem_to_hbm [thread:$0]  %s151_s8, 128, %s273_s6, [#allocation3]  }
  0xd6   :  { %199 = dma.done.wait [#allocation3], 128  }
  0xd7   :  { %200 = vsyncadd [#allocation3], 4294967168 }
  0xd8   :  { %157 = vsyncpa [#allocation3], 1 }

</bundles_post_ra>
